<compile_context>
chip_gen: v7x
topology: tpu7x:2x2x1
jax: 0.10.0
libtpu: 0.0.40
codegen_flags: <defaults>
</compile_context>

<pallas_src>
import functools

import numpy as np
import jax
import jax.numpy as jnp
from jax.experimental import pallas as pl
from jax.experimental.pallas import tpu as pltpu

_LANE = 128


# ---------------------------------------------------------------------------
# VMEM budgeting / tile selection helpers.
# ---------------------------------------------------------------------------
def _round_up(x, m):
    return ((x + m - 1) // m) * m


def _vmem_budget_bytes(frac=0.75, fallback=64 << 20):
    """Per-generation VMEM budget: ~75% of physical VMEM (≈96 MiB on v5e/v6e's 128 MiB,
    ≈48 MiB on v7x's 64 MiB), leaving headroom for compiler scratch / semaphores."""
    try:
        cap = int(pltpu.get_tpu_info().vmem_capacity_bytes)
    except Exception:
        cap = fallback
    return max(16 << 20, int(cap * frac))


def _stage2_footprint(rt, nk, n_k_blocks, d_pad):
    """VMEM bytes for one stage-2 step, accounting for 128-lane padding of the narrow
    (d_out-wide) arrays — their real footprint is d_pad(=128)-wide, not d_out-wide."""
    adj_bytes = 2 * rt * _round_up(nk, _LANE) * 2          # double-buffered bf16 adj row tile
    g_bufs = 1 if n_k_blocks == 1 else 2                   # grid-invariant g -> single buffer
    g_bytes = g_bufs * _round_up(nk, 16) * d_pad * 2       # bf16 g block (lane padded)
    out_bytes = 2 * rt * d_pad * 4                         # f32 output tile (lane padded)
    acc_bytes = rt * d_pad * 4                             # f32 accumulator scratch
    return adj_bytes + g_bytes + out_bytes + acc_bytes + (2 << 20)   # + slack


def _pick_k_block(N, rt, d_pad, budget):
    """Largest adjacency-column (K) block fitting the budget; full rows when possible.
    A partial K block would accumulate undefined padding, so nk must divide N exactly."""
    if _stage2_footprint(rt, N, 1, d_pad) <= budget:
        return N
    for nk in range((N // _LANE) * _LANE, 0, -_LANE):
        if N % nk == 0 and _stage2_footprint(rt, nk, N // nk, d_pad) <= budget:
            return nk
    return None


def _choose_stage2_tiles(N, d_out, budget, row_tile, k_cols):
    d_pad = _round_up(max(d_out, 1), _LANE)
    if N <= row_tile:
        # Keep >= 2 row tiles where cheap so both v7x TensorCores get work.
        rt = N // 2 if (N >= 256 and N % 256 == 0) else N
    else:
        rt = max(_LANE, (min(row_tile, N) // _LANE) * _LANE)
        # Grow toward 1024-row tiles while full adjacency rows still fit the budget.
        while (rt < 1024 and N >= 8 * rt
               and _stage2_footprint(2 * rt, N, 1, d_pad) <= budget):
            rt *= 2
    if k_cols is not None:
        nk = min(N, max(_LANE, (k_cols // _LANE) * _LANE))
        if nk < N and N % nk != 0:
            raise ValueError("k_cols must divide N (pad the graph or use k_cols=None)")
    else:
        nk = _pick_k_block(N, rt, d_pad, budget)
        while nk is None and rt > _LANE:
            rt = max(_LANE, rt // 2)               # shrink the tile, never clamp the limit
            nk = _pick_k_block(N, rt, d_pad, budget)
        if nk is None:
            nk = N                                 # tiny-VMEM fallback
    return rt, nk, d_pad


def _single_buffered_spec(block_shape, index_map):
    """g is grid-invariant when there is a single K block: one VMEM buffer is enough."""
    try:
        return pl.BlockSpec(block_shape, index_map, pipeline_mode=pl.Buffered(1))
    except Exception:          # pipeline_mode / Buffered unavailable in this jax version
        return pl.BlockSpec(block_shape, index_map)


# ---------------------------------------------------------------------------
# Stage 1a: softmax over parts + weighted sum of the per-partition weights (tiny).
# ---------------------------------------------------------------------------
def _ww_kernel(sp_ref, w_ref, ww_ref):
    # MyLinear.forward: softmax over the per-partition mixing weights.
    w = w_ref[...]                                   # (P, 1)
    w = w - jnp.max(w, axis=0, keepdims=True)
    e = jnp.exp(w)
    wn = e / jnp.sum(e, axis=0, keepdims=True)       # (P, 1), softmax over parts
    # Single contraction over the parts axis (replaces the per-part scaled-add loop):
    # (P, 1) * (P, D_out*D_in) summed over P -> (1, D_out*D_in).
    ww_ref[...] = jnp.sum(wn * sp_ref[...], axis=0, keepdims=True)


# ---------------------------------------------------------------------------
# Stage 1b: feature transform g = h @ ww.T, row-tiled (VMEM use independent of N).
# ---------------------------------------------------------------------------
def _g_kernel(h_ref, ww_ref, g_ref):
    # Contract over D_in: (rt, D_in) f32 @ (D_out, D_in)^T f32 -> (rt, D_out) f32.
    g = jax.lax.dot_general(h_ref[...], ww_ref[...], (((1,), (1,)), ((), ())),
                            preferred_element_type=jnp.float32)
    g_ref[...] = g.astype(g_ref.dtype)               # bf16 for the stage-2 MXU stream


# ---------------------------------------------------------------------------
# Stage 2: HBM-bound aggregation h_out = [relu](adj @ g), row- and K-tiled.
# ---------------------------------------------------------------------------
def _agg_kernel(adj_ref, g_ref, h_out_ref, acc_ref, *, apply_relu):
    k = pl.program_id(1)

    @pl.when(k == 0)
    def _():
        acc_ref[...] = jnp.zeros_like(acc_ref)

    # One MXU matmul per (row, K) tile: (rt, nk) bf16 @ (nk, d_out) bf16 -> f32 accumulate.
    acc_ref[...] += jnp.dot(adj_ref[...], g_ref[...],
                            preferred_element_type=jnp.float32)

    @pl.when(k == pl.num_programs(1) - 1)
    def _():
        acc = acc_ref[...]
        if apply_relu:
            acc = jnp.maximum(acc, 0.0)
        h_out_ref[...] = acc.astype(h_out_ref.dtype)


def gravg_layer(adj_bf16, h, sp, w, *, apply_relu, row_tile=512, k_cols=None):
    N = adj_bf16.shape[0]
    P, d_out, d_in = sp.shape
    assert h.shape == (N, d_in)
    assert w.shape == (1, P)

    budget = _vmem_budget_bytes()

    # --- stage 1a: ww = sum_p softmax(w)[p] * W_p  (tiny, one shot, N-independent) ---
    sp_flat = sp.reshape(P, d_out * d_in)            # wrapper-side reshape (free)
    ww_flat = pl.pallas_call(
        _ww_kernel,
        out_shape=jax.ShapeDtypeStruct((1, d_out * d_in), jnp.float32),
    )(sp_flat, w.reshape(P, 1))
    ww = ww_flat.reshape(d_out, d_in)                # returned as "params"

    # --- stage 1b: g = h @ ww.T, row-tiled so it never exceeds scoped VMEM at large N ---
    rt_g = N if N <= 512 else 512
    g = pl.pallas_call(
        _g_kernel,
        out_shape=jax.ShapeDtypeStruct((N, d_out), jnp.bfloat16),
        grid_spec=pltpu.PrefetchScalarGridSpec(
            num_scalar_prefetch=0,
            grid=(pl.cdiv(N, rt_g),),
            in_specs=[pl.BlockSpec((rt_g, d_in), lambda i: (i, 0)),
                      pl.BlockSpec((d_out, d_in), lambda i: (0, 0))],   # ww stays resident
            out_specs=pl.BlockSpec((rt_g, d_out), lambda i: (i, 0)),
        ),
        compiler_params=pltpu.CompilerParams(
            dimension_semantics=("parallel",),
            vmem_limit_bytes=budget),
    )(h, ww)

    # --- stage 2: tiled adj @ g (the dominant, HBM-bound stream) ---
    rt, nk, _ = _choose_stage2_tiles(N, d_out, budget, row_tile, k_cols)
    n_rows = pl.cdiv(N, rt)
    n_k = pl.cdiv(N, nk)

    def run_stage2(single_buffer_g):
        if single_buffer_g:
            g_spec = _single_buffered_spec((nk, d_out), lambda i, k: (k, 0))
        else:
            g_spec = pl.BlockSpec((nk, d_out), lambda i, k: (k, 0))
        return pl.pallas_call(
            functools.partial(_agg_kernel, apply_relu=apply_relu),
            out_shape=jax.ShapeDtypeStruct((N, d_out), jnp.float32),
            grid_spec=pltpu.PrefetchScalarGridSpec(
                num_scalar_prefetch=0,
                grid=(n_rows, n_k),                                    # reduction axis last
                in_specs=[pl.BlockSpec((rt, nk), lambda i, k: (i, k)),  # streaming adj tile
                          g_spec],
                out_specs=pl.BlockSpec((rt, d_out), lambda i, k: (i, 0)),
                scratch_shapes=[pltpu.VMEM((rt, d_out), jnp.float32)]),
            compiler_params=pltpu.CompilerParams(
                dimension_semantics=("parallel", "arbitrary"),         # rows -> megacore
                vmem_limit_bytes=budget),
        )(adj_bf16, g)

    if n_k == 1:
        try:
            h_out = run_stage2(single_buffer_g=True)
        except Exception:
            # Fall back to default double-buffering if Buffered(1) is rejected.
            h_out = run_stage2(single_buffer_g=False)
    else:
        h_out = run_stage2(single_buffer_g=False)

    return h_out, ww


def gravg_forward(adj, x, stacked_params, layer_weights, return_params=False,
                  row_tile=512, k_cols=None):
    """Pallas implementation of GraAvg.forward (dense adjacency).

    `adj` should be pre-cast to bf16 once (and cached across training steps); casting
    inside the forward streams ~6 bytes/elem of extra HBM traffic per call.
    """
    # TODO(synk): adj.spmm is a sparse matmul in the reference; implemented as dense adj @ g.
    # TODO(synk): for another ~2x on the HBM-bound adj stream, quantize adj to int8 (v5e/v6e)
    #             or fp8 e4m3 (v7x has no int MXU path) with an f32 dequant scale.
    # TODO(synk): if D_out stays at 32 in production, pad the feature dim to 128 for
    #             lane-dense (unmasked) stores and consider bf16 intermediate h.
    adj_bf16 = adj if adj.dtype == jnp.bfloat16 else adj.astype(jnp.bfloat16)
    h = x
    params = []
    num_layers = len(layer_weights)
    for i in range(num_layers):
        h, ww = gravg_layer(adj_bf16, h, stacked_params[i], layer_weights[i],
                            apply_relu=(i < num_layers - 1),
                            row_tile=row_tile, k_cols=k_cols)
        if return_params:
            params.append(ww)
    return h, params


def gravg_reference(adj, x, stacked_params, layer_weights):
    """Plain-JAX reference matching the PyTorch semantics (f32 throughout)."""
    h = x
    num_layers = len(layer_weights)
    for i in range(num_layers):
        wn = jax.nn.softmax(layer_weights[i][0])                  # softmax over parts
        ww = jnp.einsum('p,pod->od', wn, stacked_params[i])       # (D_out, D_in)
        h = (adj @ h) @ ww.T
        if i < num_layers - 1:
            h = jnp.maximum(h, 0.0)
    return h


if __name__ == "__main__":
    N, D, P, L = 256, 32, 4, 2   # nodes, hidden, num_parts, num_layers (small demo shapes)

    key = jax.random.PRNGKey(0)
    k_adj, k_x, k_sp = jax.random.split(key, 3)

    adj = jax.random.uniform(k_adj, (N, N), dtype=jnp.float32)
    adj = adj / jnp.sum(adj, axis=-1, keepdims=True)   # row-normalized dense adjacency
    x = jax.random.normal(k_x, (N, D), dtype=jnp.float32)

    # stacked per-partition GNN weights per layer, parts-major: (P, D_out, D_in)
    sp_keys = jax.random.split(k_sp, L)
    stacked_params = [
        0.5 * jax.random.normal(sp_keys[i], (P, D, D), dtype=jnp.float32)
        for i in range(L)
    ]
    # MyLinear.__init__: weight = ones(num_parts) / num_parts  (stored as (1, P))
    layer_weights = [jnp.full((1, P), 1.0 / P, dtype=jnp.float32) for _ in range(L)]

    # One-time (cacheable) bf16 cast of the adjacency, hoisted out of the forward pass.
    adj_bf16 = adj.astype(jnp.bfloat16)

    h_ref = gravg_reference(adj, x, stacked_params, layer_weights)

    # Auto-tiled path: full-row adj tiles, grid-invariant single-buffered g.
    h_out, params = gravg_forward(adj_bf16, x, stacked_params, layer_weights,
                                  return_params=True)
    h_out = jax.block_until_ready(h_out)
    np.testing.assert_allclose(np.asarray(h_out), np.asarray(h_ref),
                               rtol=2e-2, atol=2e-2)
    assert len(params) == L and params[0].shape == (D, D)

    # Forced row + K tiling: exercises the f32 accumulator / "arbitrary" reduction axis.
    h_tiled, _ = gravg_forward(adj_bf16, x, stacked_params, layer_weights,
                               row_tile=128, k_cols=128)
    h_tiled = jax.block_until_ready(h_tiled)
    np.testing.assert_allclose(np.asarray(h_tiled), np.asarray(h_ref),
                               rtol=2e-2, atol=2e-2)

    print("KERNEL_OK")
</pallas_src>

<mosaic_0001>
module attributes {stable_mosaic.version = 11 : i64} {
  func.func @_ww_kernel(%arg0: memref<4x1024xf32, #tpu.memory_space<vmem>>, %arg1: memref<4x1xf32, #tpu.memory_space<vmem>>, %arg2: memref<1x1024xf32, #tpu.memory_space<vmem>>) attributes {dimension_semantics = [], scalar_prefetch = 0 : i64, scratch_operands = 0 : i64, tpu.core_type = #tpu.core_type<tc>} {
    %c0 = arith.constant 0 : index
    %c0_0 = arith.constant 0 : index
    %0 = vector.load %arg1[%c0, %c0_0] : memref<4x1xf32, #tpu.memory_space<vmem>>, vector<4x1xf32>
    %cst = arith.constant dense<0xFF800000> : vector<1xf32>
    %1 = vector.multi_reduction <maximumf>, %0, %cst [0] : vector<4x1xf32> to vector<1xf32>
    %2 = vector.shape_cast %1 : vector<1xf32> to vector<1x1xf32>
    %3 = vector.broadcast %2 : vector<1x1xf32> to vector<4x1xf32>
    %4 = arith.subf %0, %3 : vector<4x1xf32>
    %5 = math.exp %4 : vector<4x1xf32>
    %cst_1 = arith.constant dense<0.000000e+00> : vector<1xf32>
    %6 = vector.multi_reduction <add>, %5, %cst_1 [0] : vector<4x1xf32> to vector<1xf32>
    %7 = vector.shape_cast %6 : vector<1xf32> to vector<1x1xf32>
    %8 = vector.broadcast %7 : vector<1x1xf32> to vector<4x1xf32>
    %9 = arith.divf %5, %8 : vector<4x1xf32>
    %c0_2 = arith.constant 0 : index
    %c0_3 = arith.constant 0 : index
    %10 = vector.load %arg0[%c0_2, %c0_3] : memref<4x1024xf32, #tpu.memory_space<vmem>>, vector<4x1024xf32>
    %11 = vector.broadcast %9 : vector<4x1xf32> to vector<4x1024xf32>
    %12 = arith.mulf %11, %10 : vector<4x1024xf32>
    %cst_4 = arith.constant dense<0.000000e+00> : vector<1024xf32>
    %13 = vector.multi_reduction <add>, %12, %cst_4 [0] : vector<4x1024xf32> to vector<1024xf32>
    %14 = vector.shape_cast %13 : vector<1024xf32> to vector<1x1024xf32>
    %c0_5 = arith.constant 0 : index
    %c0_6 = arith.constant 0 : index
    %15 = vector.load %arg2[%c0_5, %c0_6] : memref<1x1024xf32, #tpu.memory_space<vmem>>, vector<1x1024xf32>
    tpu.vector_store %arg2[%c0_5, %c0_6], %14 {strides = array<i32>} : memref<1x1024xf32, #tpu.memory_space<vmem>>, vector<1x1024xf32>,
    return
  }
}

</mosaic_0001>

<bundles_post_ra>
// kernel: tpu_custom_call.1
= control target key start
LH: loop header
LB: loop body
LE: loop exit
PB: predicated region body
PF: predicated region fallthrough
CT: control target
= control target key end

     0   :  { %7 = vsyncpa [#allocation3], 0  ;;  %s328_s0 = inlined_call_operand.hbm [shape: f32[4,1024], index: 0, kind: input, shape index: {}]   ;;  %s329_s1 = inlined_call_operand.vmem [shape: f32[4,1], index: 1, kind: input, shape index: {}]   ;;  %s330_s2 = inlined_call_operand.hbm [shape: f32[1,1024], index: 2, kind: output, shape index: {}]  }
   0x1   :  { %8 = vsyncpa [#allocation4], 0  ;;  %s266_s9 = smov [#allocation2]   ;;  %s218_s13 = scalar_lea.hbm %s328_s0, 512 }
   0x2   :  { %s15_s10 = sshll.u32 %s266_s9, 4  ;;  %p219_p0 = scmp.ne.s32.totalorder %s328_s0, %s218_s13  ;;  %s16_s10 = int_to_ptr.vmem [resolvable:$true] %s15_s10 }
   0x3   :  { %p222_p1 = scmp.lt.u32.totalorder %s218_s13, %s328_s0 }
   0x5   :  { %p224_p2 = pnand %p222_p1, %p219_p0 }
   0x7   :  { %227 = shalt.err (!%p224_p2)
}
   0x8   :  { %s228_s18 = scalar_lea.vmem %s16_s10, 512  ;;  %p233_p4 = scmp.lt.s32.totalorder %s16_s10, %s16_s10 }
   0x9   :  { %p229_p3 = scmp.ne.s32.totalorder %s16_s10, %s228_s18  ;;  %p234_p5 = scmp.lt.s32.totalorder %s228_s18, %s228_s18 }
   0xb   :  { %p235_p6 = por %p234_p5, %p233_p4 }
   0xd   :  { %p236_p7 = pnand %p235_p6, %p229_p3 }
   0xf   :  { %239 = shalt.err (!%p236_p7)
}
  0x10   :  { %18 = dma.hbm_to_vmem [thread:$0]  %s328_s0, 512, %s16_s10, [#allocation3]  }
  0x11   :  { %262 = dma.done.wait [#allocation3], 512  }
  0x12   :  { %263 = vsyncadd [#allocation3], 4294966784  ;;  %v267_v0 = vmov 0   ;;  %vm25_vm0 = vcmask 3072   ;;  %v24_v1 = vld [vmem:[%s329_s1] sm:$0xf]  ;;  %v146_v23 = vlaneseq }
  0x13   :  { %209 = vset.pattern.permute.xlu0 %v267_v0  ;;  %v26_v2 = vsel %vm25_vm0, %v24_v1, -inf  ;;  %v268_v21 = vmov 1966171168   ;;  %v45_v24 = vld [vmem:[#allocation2] sm:$0xff]  ;;  %v46_v25 = vld [vmem:[#allocation2 + $0x8] sm:$0xff]  ;;  %v47_v26 = vld [vmem:[#allocation2 + $0x10] sm:$0xff] }
  0x14   :  { %v27_v3 = vrot.slane %v26_v2, 4  ;;  %v144_v22 = vunpack.c.l.s4 %v268_v21  ;;  %v48_v27 = vld [vmem:[#allocation2 + $0x18] sm:$0xff]  ;;  %v147_v29 = vshrl.u32 %v146_v23, 7  ;;  %v58_v30 = vcombine.high %v45_v24, %v45_v24  ;;  %s269_s0 = smov [#allocation5]  }
  0x15   :  { %v59_v31 = vcombine.high %v46_v25, %v46_v25  ;;  %v60_v32 = vcombine.high %v47_v26, %v47_v26  ;;  %v61_v33 = vcombine.high %v48_v27, %v48_v27  ;;  %vm74_vm1 = vcmask 1043456   ;;  %s196_s1 = sshll.u32 %s269_s0, 4  ;;  %s197_s1 = int_to_ptr.vmem [resolvable:$true] %s196_s1 }
  0x16   :  { %v28_v4 = vmax.f32 %v26_v2, %v27_v3  ;;  %v145_v28 = vunpack.c.0.s8 %v144_v22  ;;  %s240_s23 = scalar_lea.vmem %s197_s1, 128  ;;  %p245_p9 = scmp.lt.s32.totalorder %s197_s1, %s197_s1 }
  0x17   :  { %p241_p8 = scmp.ne.s32.totalorder %s197_s1, %s240_s23  ;;  %p246_p10 = scmp.lt.s32.totalorder %s240_s23, %s240_s23 }
  0x18   :  { %v29_v5 = vrot.slane %v28_v4, 2  ;;  %v300_v35 = vsub.s32 %v145_v28, %v147_v29 }
  0x19   :  { %p247_p11 = por %p246_p10, %p245_p9 }
  0x1a   :  { %v30_v6 = vmax.f32 %v28_v4, %v29_v5 }
  0x1b   :  { %p248_p12 = pnand %p247_p11, %p241_p8 }
  0x1c   :  { %v31_v7 = vrot.slane %v30_v6, 1 }
  0x1e   :  { %v32_v8 = vmax.f32 %v30_v6, %v31_v7 }
  0x20   :  { %v33_v9 = vsub.f32 %v24_v1, %v32_v8 }
  0x22   :  { %v34_v10 = vmul.f32 1.442695, %v33_v9 }
  0x24   :  { %214 = vpow2.f32 %v34_v10 }
  0x2e   :  { %v215_v11 = vpop.eup %214 }
  0x2f   :  { %v36_v12 = vsel %vm25_vm0, %v215_v11, 0.0 }
  0x30   :  { %v37_v13 = vrot.slane %v36_v12, 4 }
  0x32   :  { %v38_v14 = vadd.f32 %v37_v13, %v36_v12 }
  0x34   :  { %v39_v15 = vrot.slane %v38_v14, 2 }
  0x36   :  { %v40_v16 = vadd.f32 %v39_v15, %v38_v14 }
  0x38   :  { %v41_v17 = vrot.slane %v40_v16, 1 }
  0x3a   :  { %v42_v18 = vadd.f32 %v41_v17, %v40_v16 }
  0x3c   :  { %216 = vrcp.f32 %v42_v18 }
  0x46   :  { %v217_v19 = vpop.eup %216 }
  0x47   :  { %v44_v20 = vmul.f32 %v217_v19, %v215_v11 }
  0x49   :  { %51 = vperm.xlu0 %209, %v44_v20  }
  0xc8   :  { %v52_v34 = vpop.permute.xlu0 %51 }
  0xc9   :  { %v66_v36 = vmul.f32 %v52_v34, %v45_v24  ;;  %v67_v37 = vmul.f32 %v58_v30, %v52_v34  ;;  %v68_v38 = vmul.f32 %v52_v34, %v46_v25  ;;  %v69_v39 = vmul.f32 %v59_v31, %v52_v34 }
  0xca   :  { %v70_v40 = vmul.f32 %v52_v34, %v47_v26  ;;  %v71_v41 = vmul.f32 %v60_v32, %v52_v34  ;;  %v72_v42 = vmul.f32 %v52_v34, %v48_v27  ;;  %v73_v43 = vmul.f32 %v61_v33, %v52_v34 }
  0xcb   :  { %v75_v44 = vsel %vm74_vm1, %v66_v36, 0.0  ;;  %v82_v45 = vsel %vm74_vm1, %v67_v37, 0.0  ;;  %v89_v46 = vsel %vm74_vm1, %v68_v38, 0.0  ;;  %v96_v47 = vsel %vm74_vm1, %v69_v39, 0.0 }
  0xcc   :  { %v76_v48 = vrot.slane %v75_v44, 4  ;;  %v83_v49 = vrot.slane %v82_v45, 4  ;;  %v90_v50 = vrot.slane %v89_v46, 4  ;;  %v97_v51 = vrot.slane %v96_v47, 4 }
  0xcd   :  { %v103_v52 = vsel %vm74_vm1, %v70_v40, 0.0  ;;  %v110_v53 = vsel %vm74_vm1, %v71_v41, 0.0  ;;  %v117_v54 = vsel %vm74_vm1, %v72_v42, 0.0  ;;  %v124_v55 = vsel %vm74_vm1, %v73_v43, 0.0 }
  0xce   :  { %v104_v56 = vrot.slane %v103_v52, 4  ;;  %v111_v57 = vrot.slane %v110_v53, 4  ;;  %v118_v58 = vrot.slane %v117_v54, 4  ;;  %v125_v59 = vrot.slane %v124_v55, 4 }
  0xcf   :  { %v77_v60 = vadd.f32 %v76_v48, %v75_v44  ;;  %v84_v61 = vadd.f32 %v83_v49, %v82_v45  ;;  %v91_v62 = vadd.f32 %v90_v50, %v89_v46  ;;  %v98_v63 = vadd.f32 %v97_v51, %v96_v47 }
  0xd0   :  { %v105_v0 = vadd.f32 %v104_v56, %v103_v52  ;;  %v112_v1 = vadd.f32 %v111_v57, %v110_v53  ;;  %v119_v2 = vadd.f32 %v118_v58, %v117_v54  ;;  %v126_v3 = vadd.f32 %v125_v59, %v124_v55 }
  0xd1   :  { %v78_v4 = vrot.slane %v77_v60, 2  ;;  %v85_v5 = vrot.slane %v84_v61, 2  ;;  %v92_v6 = vrot.slane %v91_v62, 2  ;;  %v99_v7 = vrot.slane %v98_v63, 2 }
  0xd2   :  { %v106_v8 = vrot.slane %v105_v0, 2  ;;  %v113_v9 = vrot.slane %v112_v1, 2  ;;  %v120_v10 = vrot.slane %v119_v2, 2  ;;  %v127_v11 = vrot.slane %v126_v3, 2 }
  0xd3   :  { %v79_v12 = vadd.f32 %v78_v4, %v77_v60  ;;  %v86_v13 = vadd.f32 %v85_v5, %v84_v61  ;;  %v93_v14 = vadd.f32 %v92_v6, %v91_v62  ;;  %v100_v15 = vadd.f32 %v99_v7, %v98_v63 }
  0xd4   :  { %v107_v16 = vadd.f32 %v106_v8, %v105_v0  ;;  %v114_v17 = vadd.f32 %v113_v9, %v112_v1  ;;  %v121_v18 = vadd.f32 %v120_v10, %v119_v2  ;;  %v128_v19 = vadd.f32 %v127_v11, %v126_v3 }
  0xd5   :  { %v80_v20 = vrot.slane %v79_v12, 1  ;;  %v87_v21 = vrot.slane %v86_v13, 1  ;;  %v94_v22 = vrot.slane %v93_v14, 1  ;;  %v101_v23 = vrot.slane %v100_v15, 1 }
  0xd6   :  { %v108_v24 = vrot.slane %v107_v16, 1  ;;  %v115_v25 = vrot.slane %v114_v17, 1  ;;  %v122_v26 = vrot.slane %v121_v18, 1  ;;  %v129_v27 = vrot.slane %v128_v19, 1 }
  0xd7   :  { %v81_v28 = vadd.f32 %v80_v20, %v79_v12  ;;  %v88_v29 = vadd.f32 %v87_v21, %v86_v13  ;;  %v95_v30 = vadd.f32 %v94_v22, %v93_v14  ;;  %v102_v31 = vadd.f32 %v101_v23, %v100_v15 }
  0xd8   :  { %v109_v32 = vadd.f32 %v108_v24, %v107_v16  ;;  %v116_v33 = vadd.f32 %v115_v25, %v114_v17  ;;  %v123_v34 = vadd.f32 %v122_v26, %v121_v18  ;;  %v130_v36 = vadd.f32 %v129_v27, %v128_v19 }
  0xd9   :  { %v139_v37 = vcombine.low %v81_v28, %v88_v29  ;;  %v140_v38 = vcombine.low %v95_v30, %v102_v31 }
  0xda   :  { %v141_v39 = vcombine.low %v109_v32, %v116_v33  ;;  %v142_v40 = vcombine.low %v123_v34, %v130_v36 }
  0xdb   :  { %v149_v41 = vrot.slane %v139_v37, %v300_v35  ;;  %v156_v42 = vrot.slane %v140_v38, %v300_v35 }
  0xdc   :  { %v163_v43 = vrot.slane %v141_v39, %v300_v35  ;;  %v170_v44 = vrot.slane %v142_v40, %v300_v35 }
  0xdd   :  { %v171_v45 = vcombine.low %v149_v41, %v156_v42 }
  0xde   :  { %v172_v46 = vcombine.low %v163_v43, %v170_v44 }
  0xdf   :  { %v179_v47 = vrot.slane %v171_v45, %v300_v35 }
  0xe0   :  { %v186_v48 = vrot.slane %v172_v46, %v300_v35 }
  0xe2   :  { %v187_v49 = vcombine.low %v179_v47, %v186_v48 }
  0xe4   :  { %189 = vst [vmem:[#allocation5] sm:$0xff] %v187_v49 }
  0xe5   :  { %251 = shalt.err (!%p248_p12)
}
  0xe6   :  { %s252_s26 = scalar_lea.hbm %s330_s2, 128 }
  0xe7   :  { %p253_p13 = scmp.ne.s32.totalorder %s330_s2, %s252_s26  ;;  %p256_p0 = scmp.lt.u32.totalorder %s252_s26, %s330_s2 }
  0xe9   :  { %p258_p1 = pnand %p256_p0, %p253_p13 }
  0xeb   :  { %261 = shalt.err (!%p258_p1)
}
  0xec   :  { %199 = dma.vmem_to_hbm [thread:$0]  %s197_s1, 128, %s330_s2, [#allocation4]  }
  0xed   :  { %264 = dma.done.wait [#allocation4], 128  }
  0xee   :  { %265 = vsyncadd [#allocation4], 4294967168 }
  0xef   :  { %203 = vsyncpa [#allocation3], 1 }
  0xf0   :  { %204 = vsyncpa [#allocation4], 1 }

</bundles_post_ra>
